<compile_context>
chip_gen: v5e
topology: v5e:2x2
jax: 0.10.0
libtpu: 0.0.40
codegen_flags: <defaults>
</compile_context>

<pallas_src>
import math

import jax
import jax.numpy as jnp
from jax.experimental import pallas as pl
from jax.experimental.pallas import tpu as pltpu


def _attention_q2_kernel(x_ref, q_ref, cste_ref, mask_ref, out_ref, attn_ref):
    # x_ref:    (L, TB, D) f32  VMEM   (block of the (L, B, D) input)
    # q_ref:    (1, D)     f32  VMEM   (lane-major query vector)
    # cste_ref: (1,)       f32  SMEM
    # mask_ref: (TB, L)    i32  VMEM   (nonzero => padded position)
    # out_ref:  (TB, D)    f32  VMEM   (block of the (B, D) pooled output)
    # attn_ref: (TB, L)    f32  VMEM   (block of the (B, L) attention weights)
    x = x_ref[...]                                      # (L, TB, D)
    qv = q_ref[...]                                     # (1, D)
    cste = cste_ref[0]
    mask = mask_ref[...]                                # (TB, L)

    d = x.shape[-1]
    inv_sqrt_d = 1.0 / math.sqrt(float(d))

    # scores[l, b] = <x[l, b, :], q>  -- VPU multiply + XLU lane-reduce over D.
    scores_lt = jnp.sum(x * qv, axis=-1)                # (L, TB)
    # Small (L*TB) relayout to the lane-dense softmax layout (L on lanes).
    scores_bl = jnp.transpose(scores_lt, (1, 0))        # (TB, L)
    scores_bl = (cste + scores_bl) * inv_sqrt_d
    scores_bl = jnp.where(mask != 0, jnp.float32(-jnp.inf), scores_bl)

    # Softmax over the sequence axis (lane axis here == torch dim=0).
    # NOTE: a fully-masked column yields NaN, matching torch softmax of all -inf.
    m = jnp.max(scores_bl, axis=-1, keepdims=True)      # (TB, 1)
    e = jnp.exp(scores_bl - m)                          # (TB, L)
    s = jnp.sum(e, axis=-1, keepdims=True)              # (TB, 1)
    attn_bl = e * (1.0 / s)                             # (TB, L)
    attn_ref[...] = attn_bl                             # lane-dense store

    # out[b, d] = sum_l attn[b, l] * x[l, b, d]  -- broadcast-mul + leading-axis
    # accumulation; only the tiny attn matrix is relaid out, never the x tile.
    attn_lt = jnp.transpose(attn_bl, (1, 0))            # (L, TB)
    out_ref[...] = jnp.sum(attn_lt[:, :, None] * x, axis=0)   # (TB, D)


def _choose_batch_tile(L, B, D, vmem_budget_bytes):
    """Largest batch tile whose double-buffered f32 streams fit the budget."""
    # Per batch row: x (L*D), mask (L), attn (L), out (D); x2 for double buffering.
    bytes_per_row = 2 * 4 * (L * D + 2 * L + D)
    tb = int(vmem_budget_bytes // bytes_per_row)
    if tb >= B or B <= 8:
        return B
    # Blocks smaller than the full batch keep the sublane dim a multiple of 8.
    return max(8, (tb // 8) * 8)


def attention_layer_q2(x_lbd, q, cste, mask_pad, *, batch_tile=None,
                       vmem_budget_bytes=10 * 1024 * 1024):
    """x_lbd: (L, B, D) f32, q: (D, 1), cste: (1,), mask_pad: (L, B) bool.
    Returns (out: (1, B, D), attn: (L, B, 1)) matching the torch module."""
    L, B, D = x_lbd.shape
    x = x_lbd.astype(jnp.float32)                          # big tensor: NOT transposed
    q_row = jnp.reshape(q.astype(jnp.float32), (1, D))     # lane-major query
    cste_arr = jnp.reshape(cste, (1,)).astype(jnp.float32)
    mask_bl = jnp.transpose(mask_pad, (1, 0)).astype(jnp.int32)   # tiny (B, L) stream

    tb = batch_tile if batch_tile is not None else _choose_batch_tile(
        L, B, D, vmem_budget_bytes)
    tb = min(int(tb), B)
    n_b = pl.cdiv(B, tb)

    grid_spec = pltpu.PrefetchScalarGridSpec(
        num_scalar_prefetch=0,
        grid=(n_b,),
        in_specs=[
            pl.BlockSpec((L, tb, D), lambda b: (0, b, 0)),         # x    (L, B, D)
            pl.BlockSpec((1, D), lambda b: (0, 0)),                # q    (1, D)
            pl.BlockSpec(memory_space=pltpu.MemorySpace.SMEM),     # cste (scalar)
            pl.BlockSpec((tb, L), lambda b: (b, 0)),               # mask (B, L)
        ],
        out_specs=[
            pl.BlockSpec((tb, D), lambda b: (b, 0)),               # out  (B, D)
            pl.BlockSpec((tb, L), lambda b: (b, 0)),               # attn (B, L)
        ],
    )

    out_bd, attn_bl = pl.pallas_call(
        _attention_q2_kernel,
        grid_spec=grid_spec,
        out_shape=(
            jax.ShapeDtypeStruct((B, D), jnp.float32),
            jax.ShapeDtypeStruct((B, L), jnp.float32),
        ),
        compiler_params=pltpu.CompilerParams(
            dimension_semantics=("parallel",),     # batch tiles are independent
            vmem_limit_bytes=32 * 1024 * 1024,     # safe on v5e/v6e/v7x
        ),
    )(x, q_row, cste_arr, mask_bl)

    out = out_bd[None, :, :]                               # (1, B, D)
    attn = jnp.transpose(attn_bl, (1, 0))[:, :, None]      # (L, B, 1)
    return out, attn


def _reference(x_lbd, q, cste, mask_pad):
    """Pure-JAX reference mirroring the torch forward pass."""
    L, B, D = x_lbd.shape
    scores = jnp.einsum("lbd,dk->lbk", x_lbd, q)                    # (L, B, 1)
    scores = (cste.reshape(()) + scores) / jnp.sqrt(jnp.float32(D))
    scores = jnp.where(mask_pad[..., None], -jnp.inf, scores)
    attn = jax.nn.softmax(scores, axis=0)                           # (L, B, 1)
    out = jnp.einsum("lbk,lbd->kbd", attn, x_lbd)                   # (1, B, D)
    return out, attn


def _check(L, B, D, seed, lens, batch_tile=None):
    key = jax.random.PRNGKey(seed)
    kx, kq, kc = jax.random.split(key, 3)
    x = jax.random.normal(kx, (L, B, D), dtype=jnp.float32)
    q = jax.random.normal(kq, (D, 1), dtype=jnp.float32)       # nn.Parameter randn((D,1))
    cste = jax.random.normal(kc, (1,), dtype=jnp.float32)      # nn.Parameter randn((1,))
    # mask_pad[l, b] = True  => position l of batch element b is padding.
    mask_pad = jnp.arange(L)[:, None] >= lens[None, :]          # (L, B) bool

    out, attn = attention_layer_q2(x, q, cste, mask_pad, batch_tile=batch_tile)
    out = jax.block_until_ready(out)
    attn = jax.block_until_ready(attn)

    out_ref, attn_ref = _reference(x, q, cste, mask_pad)
    assert out.shape == (1, B, D) and attn.shape == (L, B, 1)
    assert jnp.allclose(out, out_ref, atol=1e-5, rtol=1e-5)
    assert jnp.allclose(attn, attn_ref, atol=1e-5, rtol=1e-5)


if __name__ == "__main__":
    # Small shapes consistent with the module: seq L=8, batch B=2, input_dim D=32.
    _check(L=8, B=2, D=32, seed=0, lens=jnp.array([6, 8], dtype=jnp.int32))
    # Exercise the batch grid / double-buffered pipelining (3 tiles of 8 batch rows).
    lens2 = jax.random.randint(jax.random.PRNGKey(1), (24,), 1, 17)
    _check(L=16, B=24, D=32, seed=2, lens=lens2, batch_tile=8)
    print("KERNEL_OK")
</pallas_src>

<mosaic_0001>
module attributes {stable_mosaic.version = 11 : i64} {
  func.func @_attention_q2_kernel(%arg0: i32, %arg1: memref<8x2x32xf32, #tpu.memory_space<vmem>>, %arg2: memref<1x32xf32, #tpu.memory_space<vmem>>, %arg3: memref<1xf32, #tpu.memory_space<smem>>, %arg4: memref<2x8xi32, #tpu.memory_space<vmem>>, %arg5: memref<2x32xf32, #tpu.memory_space<vmem>>, %arg6: memref<2x8xf32, #tpu.memory_space<vmem>>) attributes {dimension_semantics = [#tpu.dimension_semantics<parallel>], iteration_bounds = array<i64: 1>, scalar_prefetch = 0 : i64, scratch_operands = 0 : i64, tpu.core_type = #tpu.core_type<tc>, window_params = [{transform_indices = @transform_0, window_bounds = array<i64: 8, 2, 32>}, {pipeline_mode = #tpu.pipeline_mode<synchronous>, transform_indices = @transform_1, window_bounds = array<i64: 1, 32>}, {transform_indices = @transform_2, window_bounds = array<i64: 1>}, {transform_indices = @transform_3, window_bounds = array<i64: 2, 8>}, {transform_indices = @transform_4, window_bounds = array<i64: 2, 32>}, {transform_indices = @transform_5, window_bounds = array<i64: 2, 8>}]} {
    %c0 = arith.constant 0 : index
    %c0_0 = arith.constant 0 : index
    %c0_1 = arith.constant 0 : index
    %0 = vector.load %arg1[%c0, %c0_0, %c0_1] : memref<8x2x32xf32, #tpu.memory_space<vmem>>, vector<8x2x32xf32>
    %c0_2 = arith.constant 0 : index
    %c0_3 = arith.constant 0 : index
    %1 = vector.load %arg2[%c0_2, %c0_3] : memref<1x32xf32, #tpu.memory_space<vmem>>, vector<1x32xf32>
    %c0_4 = arith.constant 0 : index
    %2 = memref.load %arg3[%c0_4] : memref<1xf32, #tpu.memory_space<smem>>
    %c0_5 = arith.constant 0 : index
    %c0_6 = arith.constant 0 : index
    %3 = vector.load %arg4[%c0_5, %c0_6] : memref<2x8xi32, #tpu.memory_space<vmem>>, vector<2x8xi32>
    %4 = vector.shape_cast %1 : vector<1x32xf32> to vector<1x1x32xf32>
    %5 = vector.broadcast %4 : vector<1x1x32xf32> to vector<8x2x32xf32>
    %6 = arith.mulf %0, %5 : vector<8x2x32xf32>
    %cst = arith.constant dense<0.000000e+00> : vector<8x2xf32>
    %7 = vector.multi_reduction <add>, %6, %cst [2] : vector<8x2x32xf32> to vector<8x2xf32>
    %8 = tpu.transpose %7, [1, 0] : vector<8x2xf32> -> vector<2x8xf32>
    %9 = vector.broadcast %2 : f32 to vector<2x8xf32>
    %10 = arith.addf %9, %8 : vector<2x8xf32>
    %cst_7 = arith.constant 0.176776692 : f32
    %11 = vector.broadcast %cst_7 : f32 to vector<2x8xf32>
    %12 = arith.mulf %10, %11 : vector<2x8xf32>
    %c0_i32 = arith.constant 0 : i32
    %13 = vector.broadcast %c0_i32 : i32 to vector<2x8xi32>
    %14 = arith.cmpi ne, %3, %13 : vector<2x8xi32>
    %cst_8 = arith.constant 0xFF800000 : f32
    %15 = vector.broadcast %cst_8 : f32 to vector<2x8xf32>
    %16 = arith.select %14, %15, %12 : vector<2x8xi1>, vector<2x8xf32>
    %cst_9 = arith.constant dense<0xFF800000> : vector<2xf32>
    %17 = vector.multi_reduction <maximumf>, %16, %cst_9 [1] : vector<2x8xf32> to vector<2xf32>
    %18 = vector.shape_cast %17 : vector<2xf32> to vector<2x1xf32>
    %19 = vector.broadcast %18 : vector<2x1xf32> to vector<2x8xf32>
    %20 = arith.subf %16, %19 : vector<2x8xf32>
    %21 = math.exp %20 : vector<2x8xf32>
    %cst_10 = arith.constant dense<0.000000e+00> : vector<2xf32>
    %22 = vector.multi_reduction <add>, %21, %cst_10 [1] : vector<2x8xf32> to vector<2xf32>
    %23 = vector.shape_cast %22 : vector<2xf32> to vector<2x1xf32>
    %cst_11 = arith.constant 1.000000e+00 : f32
    %24 = vector.broadcast %cst_11 : f32 to vector<2x1xf32>
    %25 = arith.divf %24, %23 : vector<2x1xf32>
    %26 = vector.broadcast %25 : vector<2x1xf32> to vector<2x8xf32>
    %27 = arith.mulf %21, %26 : vector<2x8xf32>
    %c0_12 = arith.constant 0 : index
    %c0_13 = arith.constant 0 : index
    %28 = vector.load %arg6[%c0_12, %c0_13] : memref<2x8xf32, #tpu.memory_space<vmem>>, vector<2x8xf32>
    tpu.vector_store %arg6[%c0_12, %c0_13], %27 {strides = array<i32>} : memref<2x8xf32, #tpu.memory_space<vmem>>, vector<2x8xf32>,
    %29 = tpu.transpose %27, [1, 0] : vector<2x8xf32> -> vector<8x2xf32>
    %30 = vector.shape_cast %29 : vector<8x2xf32> to vector<8x2x1xf32>
    %31 = vector.broadcast %30 : vector<8x2x1xf32> to vector<8x2x32xf32>
    %32 = arith.mulf %31, %0 : vector<8x2x32xf32>
    %cst_14 = arith.constant dense<0.000000e+00> : vector<2x32xf32>
    %33 = vector.multi_reduction <add>, %32, %cst_14 [0] : vector<8x2x32xf32> to vector<2x32xf32>
    %c0_15 = arith.constant 0 : index
    %c0_16 = arith.constant 0 : index
    %34 = vector.load %arg5[%c0_15, %c0_16] : memref<2x32xf32, #tpu.memory_space<vmem>>, vector<2x32xf32>
    tpu.vector_store %arg5[%c0_15, %c0_16], %33 {strides = array<i32>} : memref<2x32xf32, #tpu.memory_space<vmem>>, vector<2x32xf32>,
    return
  }
  func.func @transform_0(%arg0: i32) -> (i32, i32, i32) {
    %c0_i32 = arith.constant 0 : i32
    %c0_i32_0 = arith.constant 0 : i32
    %c0_i32_1 = arith.constant 0 : i32
    return %c0_i32, %arg0, %c0_i32_0 : i32, i32, i32
  }
  func.func @transform_1(%arg0: i32) -> (i32, i32) {
    %c0_i32 = arith.constant 0 : i32
    %c0_i32_0 = arith.constant 0 : i32
    %c0_i32_1 = arith.constant 0 : i32
    return %c0_i32, %c0_i32_0 : i32, i32
  }
  func.func @transform_2(%arg0: i32) -> i32 {
    %c0_i32 = arith.constant 0 : i32
    %c0_i32_0 = arith.constant 0 : i32
    return %c0_i32 : i32
  }
  func.func @transform_3(%arg0: i32) -> (i32, i32) {
    %c0_i32 = arith.constant 0 : i32
    %c0_i32_0 = arith.constant 0 : i32
    return %arg0, %c0_i32 : i32, i32
  }
  func.func @transform_4(%arg0: i32) -> (i32, i32) {
    %c0_i32 = arith.constant 0 : i32
    %c0_i32_0 = arith.constant 0 : i32
    return %arg0, %c0_i32 : i32, i32
  }
  func.func @transform_5(%arg0: i32) -> (i32, i32) {
    %c0_i32 = arith.constant 0 : i32
    %c0_i32_0 = arith.constant 0 : i32
    return %arg0, %c0_i32 : i32, i32
  }
}

</mosaic_0001>

<bundles_post_ra>
// kernel: tpu_custom_call.1
= control target key start
LH: loop header
LB: loop body
LE: loop exit
PB: predicated region body
PF: predicated region fallthrough
CT: control target
= control target key end

     0   :  { %12 = vsyncpa [#allocation4], 0  ;;  %s524_s0 = inlined_call_operand.hbm [shape: f32[8,2,32], index: 0, kind: input, shape index: {}]   ;;  %s525_s1 = inlined_call_operand.vmem [shape: f32[1,32], index: 1, kind: input, shape index: {}]   ;;  %s526_s2 = inlined_call_operand.<no memory space> [shape: f32[1], index: 2, kind: input, shape index: {}]   ;;  %s527_s3 = inlined_call_operand.vmem [shape: s32[2,8], index: 3, kind: input, shape index: {}]   ;;  %s528_s4 = inlined_call_operand.hbm [shape: f32[2,32], index: 4, kind: output, shape index: {0}]   ;;  %s529_s5 = inlined_call_operand.hbm [shape: f32[2,8], index: 5, kind: output, shape index: {1}]  }
   0x1   :  { %13 = vsyncpa [#allocation5], 0 }
   0x2   :  { %14 = vsyncpa [#allocation8], 0  ;;  %s19_s20 = sshll.u32 %s524_s0, 4  ;;  %s419_s21 = smov [#allocation3]   ;;  %s20_s20 = int_to_ptr.hbm [resolvable:$true] %s19_s20 }
   0x3   :  { %s21_s22 = sshll.u32 %s419_s21, 4  ;;  %s420_s23 = smov 32   ;;  %s22_s22 = int_to_ptr.vmem [resolvable:$true] %s21_s22 }
   0x4   :  { %s421_s24 = smov 2  }
   0x5   :  { %27 = dma.hbm_to_vmem [thread:$0]  %s20_s20, 256, %s22_s22, [#allocation4], %s420_s23, %s420_s23, %s421_s24  }
   0x6   :  { %413 = dma.done.wait [#allocation4], 256  }
   0x7   :  { %414 = vsyncadd [#allocation4], 4294967040  ;;  %v457_v0 = vld [vmem:[#allocation3] sm:$0x3]  ;;  %vm60_vm0 = vcmask 254976   ;;  %v93_v27 = vlaneseq  ;;  %vm103_vm1 = vcmask 1041409   ;;  %v150_v50 = vstv %s526_s2 }
   0x8   :  { %v336_v1 = vld [vmem:[%s525_s1] ss:$0 sm:$0xff]  ;;  %v462_v2 = vld [vmem:[#allocation3 + $0x4] sm:$0x3]  ;;  %v464_v3 = vld [vmem:[#allocation3 + $0x8] sm:$0x3] }
   0x9   :  { %v52_v4 = vmul.f32 %v336_v1, %v457_v0  ;;  %v54_v5 = vmul.f32 %v336_v1, %v462_v2  ;;  %v56_v6 = vmul.f32 %v336_v1, %v464_v3  ;;  %v469_v7 = vld [vmem:[#allocation3 + $0x2] sm:$0x3]  ;;  %v471_v8 = vld [vmem:[#allocation3 + $0x6] sm:$0x3]  ;;  %v476_v12 = vld [vmem:[#allocation3 + $0xa] sm:$0x3] }
   0xa   :  { %v53_v13 = vmul.f32 %v336_v1, %v469_v7  ;;  %v55_v14 = vmul.f32 %v336_v1, %v471_v8  ;;  %v57_v15 = vmul.f32 %v336_v1, %v476_v12  ;;  %v484_v19 = vld [vmem:[#allocation3 + $0xc] sm:$0x3]  ;;  %v486_v20 = vld [vmem:[#allocation3 + $0xe] sm:$0x3]  ;;  %v94_v29 = vand.u32 127, %v93_v27  ;;  %s422_s2 = smov [#allocation7]  }
   0xb   :  { %v61_v9 = vsel %vm60_vm0, %v52_v4, 0.0  ;;  %v67_v10 = vsel %vm60_vm0, %v54_v5, 0.0  ;;  %v73_v11 = vsel %vm60_vm0, %v56_v6, 0.0  ;;  %v58_v21 = vmul.f32 %v336_v1, %v484_v19  ;;  %v48_v51 = vld [vmem:[%s527_s3] sm:$0x3]  ;;  %s310_s3 = sshll.u32 %s422_s2, 4  ;;  %s311_s3 = int_to_ptr.vmem [resolvable:$true] %s310_s3 }
   0xc   :  { %62 = vadd.xlane.f32.xlu0 %v61_v9  ;;  %68 = vadd.xlane.f32.xlu1 %v67_v10  ;;  %v64_v16 = vsel %vm60_vm0, %v53_v13, 0.0  ;;  %v70_v17 = vsel %vm60_vm0, %v55_v14, 0.0  ;;  %v76_v18 = vsel %vm60_vm0, %v57_v15, 0.0  ;;  %v59_v22 = vmul.f32 %v336_v1, %v486_v20  ;;  %s312_s6 = sshll.u32 %s529_s5, 4  ;;  %s423_s5 = smov [#allocation6]   ;;  %s313_s6 = int_to_ptr.hbm [resolvable:$true] %s312_s6 }
   0xd   :  { %74 = vadd.xlane.f32.xlu2 %v73_v11  ;;  %v79_v23 = vsel %vm60_vm0, %v58_v21, 0.0  ;;  %vm105_vm2 = vcmask 1042434   ;;  %vm107_vm3 = vcmask 1043459   ;;  %vm109_vm4 = vcmask 1044484   ;;  %s299_s7 = sshll.u32 %s423_s5, 4  ;;  %s301_s10 = sshll.u32 %s528_s4, 4  ;;  %s300_s7 = int_to_ptr.vmem [resolvable:$true] %s299_s7  ;;  %s302_s10 = int_to_ptr.hbm [resolvable:$true] %s301_s10 }
   0xe   :  { %v82_v24 = vsel %vm60_vm0, %v59_v22, 0.0  ;;  %vm111_vm5 = vcmask 1045509   ;;  %vm113_vm6 = vcmask 1046534   ;;  %vm115_vm7 = vcmask 1047559  }
   0xf   :  { %vm153_vm8 = vcmp.ne.s32.totalorder %v48_v51, 0  ;;  %vm155_vm9 = vcmask 58368   ;;  %v216_v62 = vshrl.u32 %v93_v27, 7 }
  0x11   :  { %333 = vset.pattern.permute.xlu1 %v216_v62 }
  0x14   :  { %65 = vadd.xlane.f32.xlu0 %v64_v16  ;;  %71 = vadd.xlane.f32.xlu1 %v70_v17 }
  0x15   :  { %77 = vadd.xlane.f32.xlu2 %v76_v18 }
  0x1c   :  { %80 = vadd.xlane.f32.xlu0 %v79_v23  ;;  %83 = vadd.xlane.f32.xlu1 %v82_v24 }
  0x7f   :  { %v63_v25 = vpop.xlane.xlu0 %62  ;;  %v69_v26 = vpop.xlane.xlu1 %68 }
  0x80   :  { %v75_v28 = vpop.xlane.xlu2 %74  ;;  %v95_v32 = vperm.slane %v63_v25, %v94_v29  ;;  %v97_v35 = vperm.slane %v69_v26, %v94_v29 }
  0x81   :  { %v99_v39 = vperm.slane %v75_v28, %v94_v29 }
  0x87   :  { %v66_v30 = vpop.xlane.xlu0 %65  ;;  %v72_v31 = vpop.xlane.xlu1 %71 }
  0x88   :  { %v96_v33 = vperm.slane %v66_v30, %v94_v29  ;;  %v98_v34 = vperm.slane %v72_v31, %v94_v29  ;;  %v78_v37 = vpop.xlane.xlu2 %77 }
  0x89   :  { %v100_v41 = vperm.slane %v78_v37, %v94_v29 }
  0x8a   :  { %v104_v36 = vsel %vm103_vm1, %v96_v33, %v95_v32 }
  0x8b   :  { %v106_v38 = vsel %vm105_vm2, %v97_v35, %v104_v36 }
  0x8c   :  { %v108_v40 = vsel %vm107_vm3, %v98_v34, %v106_v38 }
  0x8d   :  { %v110_v42 = vsel %vm109_vm4, %v99_v39, %v108_v40 }
  0x8e   :  { %v112_v47 = vsel %vm111_vm5, %v100_v41, %v110_v42 }
  0x8f   :  { %v81_v43 = vpop.xlane.xlu0 %80  ;;  %v84_v44 = vpop.xlane.xlu1 %83 }
  0x90   :  { %v101_v45 = vperm.slane %v81_v43, %v94_v29  ;;  %v102_v46 = vperm.slane %v84_v44, %v94_v29 }
  0x92   :  { %v114_v48 = vsel %vm113_vm6, %v101_v45, %v112_v47 }
  0x93   :  { %v116_v49 = vsel %vm115_vm7, %v102_v46, %v114_v48 }
  0x94   :  { %118 = vxpose.xlu2.b32.start.end [1/1] (short) (narrow) %v116_v49, 8 }
  0xf6   :  { %334 = vset.pattern.permute.xlu2 %v216_v62 }
 0x12d   :  { %v134_v52 = vpop.trf.xlu2 }
 0x12e   :  { %v151_v53 = vadd.f32 %v150_v50, %v134_v52 }
 0x130   :  { %v152_v54 = vmul.f32 0.17677669, %v151_v53 }
 0x132   :  { %v154_v55 = vsel %vm153_vm8, -inf, %v152_v54 }
 0x133   :  { %v156_v56 = vsel %vm155_vm9, %v154_v55, -inf }
 0x134   :  { %157 = vmax.xlane.f32.xlu0 %v156_v56 }
 0x1a7   :  { %v158_v57 = vpop.xlane.xlu0 %157 }
 0x1a8   :  { %v159_v58 = vsub.f32 %v154_v55, %v158_v57 }
 0x1aa   :  { %v160_v59 = vmul.f32 1.442695, %v159_v58 }
 0x1ac   :  { %337 = vpow2.f32 %v160_v59 }
 0x1b2   :  { %v338_v60 = vpop.eup %337 }
 0x1b3   :  { %v162_v61 = vsel %vm155_vm9, %v338_v60, 0.0 }
 0x1b4   :  { %163 = vadd.xlane.f32.xlu1 %v162_v61 }
 0x227   :  { %v164_v63 = vpop.xlane.xlu1 %163 }
 0x228   :  { %339 = vrcp.f32 %v164_v63  ;;  %v176_v6 = vand.u32 2147483648, %v164_v63  ;;  %v174_v10 = vand.u32 2147483647, %v164_v63  ;;  %vm170_vm11 = vweird.f32 %v164_v63 }
 0x22a   :  { %v177_v13 = vor.u32 1.1754944e-38, %v176_v6  ;;  %vm175_vm13 = vcmp.eq.f32.partialorder %v174_v10, 8.507059e+37 }
 0x22e   :  { %v340_v1 = vpop.eup %339 }
 0x22f   :  { %v166_v4 = vmul.f32 %v340_v1, %v164_v63  ;;  %vm171_vm10 = vweird.f32 %v340_v1 }
 0x230   :  { %vm172_vm12 = vmor %vm170_vm11, %vm171_vm10 }
 0x231   :  { %v167_v5 = vsub.f32 1.0, %v166_v4 }
 0x233   :  { %v168_v9 = vmul.f32 %v340_v1, %v167_v5 }
 0x235   :  { %v169_v11 = vadd.f32 %v340_v1, %v168_v9 }
 0x237   :  { %v173_v14 = vsel %vm172_vm12, %v340_v1, %v169_v11 }
 0x238   :  { %v178_v15 = vsel %vm175_vm13, %v177_v13, %v173_v14 }
 0x239   :  { %v180_v16 = vmul.f32 %v338_v60, %v178_v15 }
 0x23b   :  { %182 = vxpose.xlu0.b32.start.end [1/1] (short) (narrow) %v180_v16, 8  ;;  %181 = vst.msk [vmem:[#allocation7] sm:$0x3] %vm155_vm9, %v180_v16 }
 0x23c   :  { %315 = dma.vmem_to_hbm [thread:$0]  %s311_s3, 32, %s313_s6, [#allocation8]  }
 0x2a2   :  { %335 = vset.pattern.permute.xlu0 %v216_v62 }
 0x2df   :  { %v198_v17 = vpop.trf.xlu0 }
 0x2e0   :  { %v242_v18 = vperm.slane %v198_v17, 4  ;;  %v228_v21 = vperm.slane %v198_v17, 2  ;;  %v214_v22 = vperm.slane %v198_v17, 0  ;;  %v221_v23 = vperm.slane %v198_v17, 1 }
 0x2e1   :  { %v235_v24 = vperm.slane %v198_v17, 3  ;;  %v249_v25 = vperm.slane %v198_v17, 5  ;;  %v256_v26 = vperm.slane %v198_v17, 6  ;;  %v263_v27 = vperm.slane %v198_v17, 7 }
 0x2e2   :  { %247 = vperm.xlu0 %335, %v242_v18   ;;  %233 = vperm.xlu2 %334, %v228_v21  }
 0x2e3   :  { %219 = vperm.xlu1 %333, %v214_v22  }
 0x2eb   :  { %226 = vperm.xlu1 %333, %v221_v23  }
 0x2f3   :  { %240 = vperm.xlu1 %333, %v235_v24  }
 0x2fb   :  { %254 = vperm.xlu1 %333, %v249_v25  }
 0x303   :  { %261 = vperm.xlu1 %333, %v256_v26  }
 0x30b   :  { %268 = vperm.xlu1 %333, %v263_v27  }
 0x33c   :  { %v234_v33 = vpop.permute.xlu2 %233 }
 0x33d   :  { %v272_v36 = vmul.f32 %v234_v33, %v462_v2 }
 0x33f   :  { %v281_v41 = vsel %vm60_vm0, %v272_v36, 0.0 }
 0x354   :  { %v248_v40 = vpop.permute.xlu0 %247 }
 0x355   :  { %v220_v28 = vpop.permute.xlu1 %219 }
 0x356   :  { %v270_v32 = vmul.f32 %v220_v28, %v457_v0  ;;  %v274_v0 = vmul.f32 %v248_v40, %v464_v3 }
 0x358   :  { %v278_v37 = vsel %vm60_vm0, %v270_v32, 0.0  ;;  %v285_v2 = vsel %vm60_vm0, %v274_v0, 0.0 }
 0x35d   :  { %v227_v29 = vpop.permute.xlu1 %226 }
 0x35e   :  { %v271_v31 = vmul.f32 %v227_v29, %v469_v7 }
 0x360   :  { %v279_v35 = vsel %vm60_vm0, %v271_v31, 0.0 }
 0x361   :  { %v280_v39 = vadd.f32 %v279_v35, %v278_v37 }
 0x363   :  { %v282_v43 = vadd.f32 %v281_v41, %v280_v39 }
 0x365   :  { %v241_v30 = vpop.permute.xlu1 %240 }
 0x366   :  { %v273_v38 = vmul.f32 %v241_v30, %v471_v8 }
 0x368   :  { %v283_v42 = vsel %vm60_vm0, %v273_v38, 0.0 }
 0x369   :  { %v284_v45 = vadd.f32 %v283_v42, %v282_v43 }
 0x36b   :  { %v286_v8 = vadd.f32 %v285_v2, %v284_v45 }
 0x36d   :  { %v255_v34 = vpop.permute.xlu1 %254 }
 0x36e   :  { %v275_v44 = vmul.f32 %v255_v34, %v476_v12 }
 0x370   :  { %v287_v47 = vsel %vm60_vm0, %v275_v44, 0.0 }
 0x371   :  { %v288_v49 = vadd.f32 %v287_v47, %v286_v8 }
 0x375   :  { %v262_v7 = vpop.permute.xlu1 %261 }
 0x376   :  { %v276_v46 = vmul.f32 %v262_v7, %v484_v19 }
 0x378   :  { %v289_v48 = vsel %vm60_vm0, %v276_v46, 0.0 }
 0x379   :  { %v290_v3 = vadd.f32 %v289_v48, %v288_v49 }
 0x37d   :  { %v269_v50 = vpop.permute.xlu1 %268 }
 0x37e   :  { %v277_v51 = vmul.f32 %v269_v50, %v486_v20 }
 0x380   :  { %v291_v12 = vsel %vm60_vm0, %v277_v51, 0.0 }
 0x381   :  { %v292_v19 = vadd.f32 %v291_v12, %v290_v3 }
 0x383   :  { %293 = vst.msk [vmem:[#allocation6] sm:$0x3] %vm60_vm0, %v292_v19 }
 0x384   :  { %304 = dma.vmem_to_hbm [thread:$0]  %s300_s7, 32, %s302_s10, [#allocation5]  }
 0x385   :  { %415 = dma.done.wait [#allocation5], 32  }
 0x386   :  { %416 = vsyncadd [#allocation5], 4294967264 }
 0x387   :  { %417 = dma.done.wait [#allocation8], 32  }
 0x388   :  { %418 = vsyncadd [#allocation8], 4294967264 }
 0x389   :  { %324 = vsyncpa [#allocation4], 1 }
 0x38a   :  { %325 = vsyncpa [#allocation5], 1 }
 0x38b   :  { %326 = vsyncpa [#allocation8], 1 }

</bundles_post_ra>
